<compile_context>
chip_gen: v7x
topology: tpu7x:2x2x1
jax: 0.10.0
libtpu: 0.0.40
codegen_flags: <defaults>
</compile_context>

<pallas_src>
import jax
import jax.numpy as jnp
from jax.experimental import pallas as pl
from jax.experimental.pallas import tpu as pltpu

LANE = 128


def _decoder_kernel(x1_ref, x2_ref, w1_ref, w2_ref, shift_ref, out_ref):
    # Tiles are channel-major: (C, tile_p), pixels on the lane axis.
    x1 = x1_ref[0]                       # (C1, tp)  pooled x1 channels
    x2 = x2_ref[0]                       # (C2, tp)
    # 1x1 conv == per-pixel channel matmul; concat replaced by two f32-acc dots.
    y = jnp.dot(w1_ref[...], x1, preferred_element_type=jnp.float32)
    y = y + jnp.dot(w2_ref[...], x2, preferred_element_type=jnp.float32)
    # BN scale is folded into the weights; add the remaining shift, then ReLU.
    y = y + shift_ref[...]               # (out_ch, 1) lane-broadcast, f32
    out_ref[0] = jnp.maximum(y, 0.0).astype(out_ref.dtype)


def _round_up(a, b):
    return ((a + b - 1) // b) * b


def decoder_forward(x1, x2, weight, gamma, beta, running_mean, running_var,
                    *, downsample=True, eps=1e-5, tile_p=2048,
                    compute_dtype=jnp.bfloat16):
    """x1, x2 in NCHW (PyTorch convention); returns NCHW float32 output."""
    N, C1, H, W = x1.shape
    N2, C2, Hh, Wh = x2.shape
    out_ch, in_ch, kh, kw = weight.shape
    assert kh == 1 and kw == 1 and in_ch == C1 + C2 and N2 == N

    if downsample:
        assert H == 2 * Hh and W == 2 * Wh
        # 2x2 max-pool as reshape+max, fused by XLA with the cast below; the
        # kernel then reads only the pooled (minimal) data, one DMA per tile.
        x1p = x1.reshape(N, C1, Hh, 2, Wh, 2).max(axis=(3, 5))
    else:
        assert H == Hh and W == Wh
        x1p = x1                          # no-pool path: x1 read exactly once

    HWo = Hh * Wh
    # Channel-major flattening: (N, C, H*W). No layout transposes, no padding.
    x1f = x1p.reshape(N, C1, HWo).astype(compute_dtype)
    x2f = x2.reshape(N, C2, HWo).astype(compute_dtype)

    # Fold BN (inference) into the conv in f32; cast streamed weights after.
    scale = (gamma.astype(jnp.float32)
             / jnp.sqrt(running_var.astype(jnp.float32) + eps))     # (out_ch,)
    w2d = weight.reshape(out_ch, in_ch).astype(jnp.float32) * scale[:, None]
    w1 = w2d[:, :C1].astype(compute_dtype)               # (out_ch, C1)
    w2 = w2d[:, C1:].astype(compute_dtype)               # (out_ch, C2)
    shift = (beta.astype(jnp.float32)
             - running_mean.astype(jnp.float32) * scale).reshape(out_ch, 1)

    # ---- Pixel-tile selection, bounded by a conservative VMEM budget -------
    in_bytes = jnp.dtype(compute_dtype).itemsize
    out_bytes = 4                                         # f32 output
    target = _round_up(max(int(tile_p), LANE), LANE)

    stream_bytes_per_pix = (C1 + C2) * in_bytes + out_ch * out_bytes
    # Weights/shift are double-buffered by the pipeline (constant index_map,
    # fetched once); account for both buffers in the budget.
    w_vmem = 2 * (out_ch * (C1 + C2) * in_bytes + out_ch * 4)
    stream_budget = 24 * 1024 * 1024      # keeps headroom on v7x (64 MiB VMEM)
    max_tp = (stream_budget - w_vmem) // (2 * stream_bytes_per_pix)
    max_tp = max(LANE, (max_tp // LANE) * LANE)
    target = min(target, max_tp)

    if HWo <= target:
        tp = HWo                          # single full-extent pixel block
    else:
        tp = target                       # multiple of 128; last block partial
    n_pix = pl.cdiv(HWo, tp)

    # v7x megacore: keep >= 2 parallel grid steps when N == 1 so both
    # TensorCores get work (no-op on single-TC v5e/v6e).
    if N == 1 and n_pix == 1 and HWo >= 2 * LANE:
        tp = _round_up(pl.cdiv(HWo, 2), LANE)
        n_pix = pl.cdiv(HWo, tp)

    footprint = 2 * stream_bytes_per_pix * tp + w_vmem
    vmem_limit = int(min(max(32 * 1024 * 1024, footprint + (8 << 20)),
                         56 * 1024 * 1024))

    # ---- Kernel launch ------------------------------------------------------
    pix_spec = lambda C: pl.BlockSpec((1, C, tp), lambda n, j: (n, 0, j))
    rep_spec = lambda r, c: pl.BlockSpec((r, c), lambda n, j: (0, 0))

    out_flat = pl.pallas_call(
        _decoder_kernel,
        out_shape=jax.ShapeDtypeStruct((N, out_ch, HWo), jnp.float32),
        grid_spec=pltpu.PrefetchScalarGridSpec(
            num_scalar_prefetch=0,
            grid=(N, n_pix),
            in_specs=[pix_spec(C1), pix_spec(C2),
                      rep_spec(out_ch, C1), rep_spec(out_ch, C2),
                      rep_spec(out_ch, 1)],
            out_specs=pl.BlockSpec((1, out_ch, tp), lambda n, j: (n, 0, j)),
        ),
        compiler_params=pltpu.CompilerParams(
            dimension_semantics=("parallel", "parallel"),
            vmem_limit_bytes=vmem_limit),
    )(x1f, x2f, w1, w2, shift)

    # Pure view back to NCHW (no transpose, no slice -- output was never padded).
    return out_flat.reshape(N, out_ch, Hh, Wh)


def decoder_reference(x1, x2, weight, gamma, beta, running_mean, running_var,
                      *, downsample=True, eps=1e-5):
    """Plain-JAX reference mirroring the PyTorch forward (eval-mode BN)."""
    if downsample:
        N, C1, H, W = x1.shape
        x1 = x1.reshape(N, C1, H // 2, 2, W // 2, 2).max(axis=(3, 5))
    x = jnp.concatenate([x1, x2], axis=1)                       # NCHW
    w2d = weight.reshape(weight.shape[0], weight.shape[1])      # (out, in)
    y = jnp.einsum('nchw,oc->nohw', x, w2d)
    scale = gamma / jnp.sqrt(running_var + eps)
    shift = beta - running_mean * scale
    y = y * scale[None, :, None, None] + shift[None, :, None, None]
    return jnp.maximum(y, 0.0)


if __name__ == "__main__":
    # Small shapes consistent with the module: decoder(in_ch=8, out_ch=8)
    # x1: (2, 4, 16, 16) -> maxpooled to (2, 4, 8, 8);  x2: (2, 4, 8, 8)
    N, C1, H, W = 2, 4, 16, 16
    C2, Hh, Wh = 4, 8, 8
    in_ch, out_ch = C1 + C2, 8

    key = jax.random.PRNGKey(0)
    k_x1, k_x2, k_w, k_x1b = jax.random.split(key, 4)
    x1 = jax.random.normal(k_x1, (N, C1, H, W), dtype=jnp.float32)
    x2 = jax.random.normal(k_x2, (N, C2, Hh, Wh), dtype=jnp.float32)
    x1b = jax.random.normal(k_x1b, (N, C1, Hh, Wh), dtype=jnp.float32)

    # Deterministic synthetic parameters (not a checkpoint load).
    weight = jax.random.normal(k_w, (out_ch, in_ch, 1, 1), dtype=jnp.float32) * 0.1
    gamma = 1.0 + 0.10 * jnp.arange(out_ch, dtype=jnp.float32)
    beta = 0.05 * jnp.arange(out_ch, dtype=jnp.float32)
    running_mean = 0.01 * jnp.arange(out_ch, dtype=jnp.float32)
    running_var = 1.0 + 0.02 * jnp.arange(out_ch, dtype=jnp.float32)

    params = (weight, gamma, beta, running_mean, running_var)

    # downsample=True, f32 streaming (tight numerical check)
    ref = decoder_reference(x1, x2, *params, downsample=True)
    out_f32 = decoder_forward(x1, x2, *params, downsample=True,
                              compute_dtype=jnp.float32)
    out_f32 = jax.block_until_ready(out_f32)
    assert out_f32.shape == (N, out_ch, Hh, Wh)
    assert jnp.allclose(out_f32, ref, atol=1e-5, rtol=1e-5)

    # downsample=True, default bf16 streaming (bf16-appropriate tolerance)
    out_bf = jax.block_until_ready(
        decoder_forward(x1, x2, *params, downsample=True))
    assert out_bf.shape == (N, out_ch, Hh, Wh)
    assert jnp.allclose(out_bf, ref, atol=5e-2, rtol=5e-2)

    # downsample=False path (x1 already at the x2 resolution), bf16
    ref_nd = decoder_reference(x1b, x2, *params, downsample=False)
    out_nd = jax.block_until_ready(
        decoder_forward(x1b, x2, *params, downsample=False))
    assert jnp.allclose(out_nd, ref_nd, atol=5e-2, rtol=5e-2)

    print("KERNEL_OK")
</pallas_src>

<mosaic_0001>
module attributes {stable_mosaic.version = 11 : i64} {
  func.func @_decoder_kernel(%arg0: i32, %arg1: i32, %arg2: memref<1x4x64xf32, #tpu.memory_space<vmem>>, %arg3: memref<1x4x64xf32, #tpu.memory_space<vmem>>, %arg4: memref<8x4xf32, #tpu.memory_space<vmem>>, %arg5: memref<8x4xf32, #tpu.memory_space<vmem>>, %arg6: memref<8x1xf32, #tpu.memory_space<vmem>>, %arg7: memref<1x8x64xf32, #tpu.memory_space<vmem>>) attributes {dimension_semantics = [#tpu.dimension_semantics<parallel>, #tpu.dimension_semantics<parallel>], iteration_bounds = array<i64: 2, 1>, scalar_prefetch = 0 : i64, scratch_operands = 0 : i64, tpu.core_type = #tpu.core_type<tc>, window_params = [{transform_indices = @transform_0, window_bounds = array<i64: 1, 4, 64>}, {transform_indices = @transform_1, window_bounds = array<i64: 1, 4, 64>}, {pipeline_mode = #tpu.pipeline_mode<synchronous>, transform_indices = @transform_2, window_bounds = array<i64: 8, 4>}, {pipeline_mode = #tpu.pipeline_mode<synchronous>, transform_indices = @transform_3, window_bounds = array<i64: 8, 4>}, {pipeline_mode = #tpu.pipeline_mode<synchronous>, transform_indices = @transform_4, window_bounds = array<i64: 8, 1>}, {transform_indices = @transform_5, window_bounds = array<i64: 1, 8, 64>}]} {
    %c0 = arith.constant 0 : index
    %c0_0 = arith.constant 0 : index
    %c0_1 = arith.constant 0 : index
    %0 = vector.load %arg2[%c0, %c0_0, %c0_1] : memref<1x4x64xf32, #tpu.memory_space<vmem>>, vector<1x4x64xf32>
    %1 = vector.shape_cast %0 : vector<1x4x64xf32> to vector<4x64xf32>
    %c0_2 = arith.constant 0 : index
    %c0_3 = arith.constant 0 : index
    %c0_4 = arith.constant 0 : index
    %2 = vector.load %arg3[%c0_2, %c0_3, %c0_4] : memref<1x4x64xf32, #tpu.memory_space<vmem>>, vector<1x4x64xf32>
    %3 = vector.shape_cast %2 : vector<1x4x64xf32> to vector<4x64xf32>
    %c0_5 = arith.constant 0 : index
    %c0_6 = arith.constant 0 : index
    %4 = vector.load %arg4[%c0_5, %c0_6] : memref<8x4xf32, #tpu.memory_space<vmem>>, vector<8x4xf32>
    %cst = arith.constant dense<0.000000e+00> : vector<8x64xf32>
    %5 = tpu.matmul %4, %1, %cst {dimension_numbers = #tpu.dot_dimension_numbers<[1], [0], [0], [1], [0, 0, 1, 1], [], []>} : vector<8x4xf32>, vector<4x64xf32>, vector<8x64xf32> -> vector<8x64xf32>
    %c0_7 = arith.constant 0 : index
    %c0_8 = arith.constant 0 : index
    %6 = vector.load %arg5[%c0_7, %c0_8] : memref<8x4xf32, #tpu.memory_space<vmem>>, vector<8x4xf32>
    %cst_9 = arith.constant dense<0.000000e+00> : vector<8x64xf32>
    %7 = tpu.matmul %6, %3, %cst_9 {dimension_numbers = #tpu.dot_dimension_numbers<[1], [0], [0], [1], [0, 0, 1, 1], [], []>} : vector<8x4xf32>, vector<4x64xf32>, vector<8x64xf32> -> vector<8x64xf32>
    %8 = arith.addf %5, %7 : vector<8x64xf32>
    %c0_10 = arith.constant 0 : index
    %c0_11 = arith.constant 0 : index
    %9 = vector.load %arg6[%c0_10, %c0_11] : memref<8x1xf32, #tpu.memory_space<vmem>>, vector<8x1xf32>
    %10 = vector.broadcast %9 : vector<8x1xf32> to vector<8x64xf32>
    %11 = arith.addf %8, %10 : vector<8x64xf32>
    %cst_12 = arith.constant 0.000000e+00 : f32
    %12 = vector.broadcast %cst_12 : f32 to vector<8x64xf32>
    %13 = arith.maximumf %11, %12 : vector<8x64xf32>
    %c0_13 = arith.constant 0 : index
    %c0_14 = arith.constant 0 : index
    %c0_15 = arith.constant 0 : index
    %14 = vector.load %arg7[%c0_13, %c0_14, %c0_15] : memref<1x8x64xf32, #tpu.memory_space<vmem>>, vector<1x8x64xf32>
    %15 = vector.shape_cast %14 : vector<1x8x64xf32> to vector<8x64xf32>
    %16 = vector.shape_cast %13 : vector<8x64xf32> to vector<1x8x64xf32>
    tpu.vector_store %arg7[%c0_13, %c0_14, %c0_15], %16 {strides = array<i32>} : memref<1x8x64xf32, #tpu.memory_space<vmem>>, vector<1x8x64xf32>,
    return
  }
  func.func @transform_0(%arg0: i32, %arg1: i32) -> (i32, i32, i32) {
    %c0_i32 = arith.constant 0 : i32
    %c0_i32_0 = arith.constant 0 : i32
    return %arg0, %c0_i32, %arg1 : i32, i32, i32
  }
  func.func @transform_1(%arg0: i32, %arg1: i32) -> (i32, i32, i32) {
    %c0_i32 = arith.constant 0 : i32
    %c0_i32_0 = arith.constant 0 : i32
    return %arg0, %c0_i32, %arg1 : i32, i32, i32
  }
  func.func @transform_2(%arg0: i32, %arg1: i32) -> (i32, i32) {
    %c0_i32 = arith.constant 0 : i32
    %c0_i32_0 = arith.constant 0 : i32
    %c0_i32_1 = arith.constant 0 : i32
    return %c0_i32, %c0_i32_0 : i32, i32
  }
  func.func @transform_3(%arg0: i32, %arg1: i32) -> (i32, i32) {
    %c0_i32 = arith.constant 0 : i32
    %c0_i32_0 = arith.constant 0 : i32
    %c0_i32_1 = arith.constant 0 : i32
    return %c0_i32, %c0_i32_0 : i32, i32
  }
  func.func @transform_4(%arg0: i32, %arg1: i32) -> (i32, i32) {
    %c0_i32 = arith.constant 0 : i32
    %c0_i32_0 = arith.constant 0 : i32
    %c0_i32_1 = arith.constant 0 : i32
    return %c0_i32, %c0_i32_0 : i32, i32
  }
  func.func @transform_5(%arg0: i32, %arg1: i32) -> (i32, i32, i32) {
    %c0_i32 = arith.constant 0 : i32
    %c0_i32_0 = arith.constant 0 : i32
    return %arg0, %c0_i32, %arg1 : i32, i32, i32
  }
}

</mosaic_0001>

<bundles_post_ra>
// kernel: tpu_custom_call.1
= control target key start
LH: loop header
LB: loop body
LE: loop exit
PB: predicated region body
PF: predicated region fallthrough
CT: control target
= control target key end

     0   :  { %10 = vsyncpa [#allocation3], 0  ;;  %s869_s0 = inlined_call_operand.vmem [shape: f32[2,4,64], index: 0, kind: input, shape index: {}]   ;;  %s870_s1 = inlined_call_operand.vmem [shape: f32[2,4,64], index: 1, kind: input, shape index: {}]   ;;  %s871_s2 = inlined_call_operand.vmem [shape: f32[8,4], index: 2, kind: input, shape index: {}]   ;;  %s872_s3 = inlined_call_operand.vmem [shape: f32[8,4], index: 3, kind: input, shape index: {}]   ;;  %s873_s4 = inlined_call_operand.vmem [shape: f32[8,1], index: 4, kind: input, shape index: {}]   ;;  %s874_s5 = inlined_call_operand.hbm [shape: f32[2,8,64], index: 5, kind: output, shape index: {}]  }
   0x1   :  { %12 = vsyncpa [#allocation3 + $0x1], 0  ;;  %s745_s18 = smov 0   ;;  %s747_s19 = smov 0  }
   0x2   :  { %s749_s20 = smov 0   ;;  %s751_s21 = smov 0  }
   0x3   :  { %s753_s22 = smov 0   ;;  %s755_s23 = smov 0  }
   0x4 LB: > { %s542_s24 = sadd.s32 4294967295, %s709_s23   ;;  %s543_s25 = sadd.s32 4294967294, %s709_s23   ;;  %s709_s23 = sphi %s755_s23, %s18_s23   ;;  %s705_s22 = sphi %s753_s22, %s881_s22   ;;  %s701_s21 = sphi %s751_s21, %s880_s21   ;;  %s697_s20 = sphi %s749_s20, %s879_s20   ;;  %s693_s19 = sphi %s747_s19, %s878_s19   ;;  %s689_s18 = sphi %s745_s18, %s877_s18  }
   0x5   : > { %s30_s26 = sadd.s32 1, %s705_s22  ;;  %s158_s27 = sadd.s32 1, %s697_s20 }
   0x6   : > { %p32_p0 = scmp.ge.s32.totalorder %s30_s26, 2  ;;  %p168_p1 = scmp.ne.s32.totalorder %s697_s20, %s693_s19 }
   0x7   : > { %p169_p2 = scmp.eq.s32.totalorder %s542_s24, 1  ;;  %p174_p3 = scmp.ne.s32.totalorder %s693_s19, %s689_s18 }
   0x8   : > { %s883_s26 = smov (%p32_p0, %s30_s26), 0  ;;  %p175_p5 = scmp.eq.s32.totalorder %s543_s25, 1 }
   0x9   : > { %p785_p4 = por %p169_p2, %p168_p1  ;;  %s153_s29 = ssub.s32 %s705_s22, %s883_s26 }
   0xa   : > { %p546_p6 = scmp.ge.s32.totalorder %s709_s23, 1  ;;  %p156_p7 = scmp.eq.s32.totalorder %s153_s29, 0 }
   0xb   : > { %p792_p8 = por %p175_p5, %p174_p3  ;;  %p222_p9 = scmp.lt.s32.totalorder %s709_s23, 3 }
   0xc   : > { %s798_s6 = scalar_select %p156_p7, %s697_s20, %s158_s27  }
   0xd   : > { %p223_p10 = pnand %p546_p6, %p222_p9 }
   0xe   : > { %p259_p11 = scmp.lt.s32.totalorder (!%p223_p10), %s701_s21, 1  ;;  %v711_v0 = vmov (!%p223_p10), 0.0   ;;  %v431_v1 = vld [vmem:[%s873_s4] sm:$0xff] (!%p223_p10)  ;;  %vm712_vm0 = vmmov (!%p223_p10), 0   ;;  %v713_v2 = vmov (!%p223_p10), 0   ;;  %vm281_vm1 = vcmask (!%p223_p10), 1043456  }
   0xf   : > { %226 = sbr.rel (%p223_p10) target bundleno = 261 (0x105), region = 40  ;;  %562 = vmatprep.subr.mxu0 (!%p223_p10), %v711_v0  ;;  %567 = vmatprep.subr.mxu1 (!%p223_p10), %v711_v0  ;;  %v276_v3 = vld [vmem:[%s872_s3] sm:$0xff] (!%p223_p10)  ;;  %vm277_vm2 = vcmask (!%p223_p10), 31744   ;;  %s256_s29 = sand.u32 (!%p223_p10), 1, %s693_s19   ;;  %vm439_vm3 = vcmask (!%p223_p10), 523264  }
  0x10   : > { %564 = vmatprep.mubr.msk.f32.mxu0 (!%p223_p10), %vm712_vm0, %v711_v0  ;;  %569 = vmatprep.mubr.msk.f32.mxu1 (!%p223_p10), %vm712_vm0, %v711_v0  ;;  %v275_v4 = vld [vmem:[%s871_s2] sm:$0xff] (!%p223_p10)  ;;  %s547_s7 = sshll.u32 (!%p223_p10), %s256_s29, 3  ;;  %s555_s8 = sshll.u32 (!%p223_p10), %s701_s21, 7 }
  0x11   : > { %630 = vset.pattern.permute.xlu0 (!%p223_p10), %v713_v2  ;;  %s442_s14 = scalar_lea.sflag (!%p223_p10), [#allocation3], %s256_s29 }
  0x12   : > { %434 = vperm.xlu0 (!%p223_p10), %630, %v431_v1  }
  0x16   : > { %s260_s9 = scalar_select %p259_p11, %s701_s21, 1 }
  0x17   : > { %s714_s21 = smov [#allocation2]  }
  0x18   : > { %s548_s10 = sshll.u32 %s260_s9, 2  ;;  %s258_s9 = scalar_lea.vmem [#allocation2], %s547_s7 }
  0x19   : > { %s272_s13 = scalar_lea.vmem %s870_s1, %s548_s10  ;;  %s265_s16 = scalar_lea.vmem %s869_s0, %s548_s10 }
  0x1a   : > { %v274_v5 = vld [vmem:[%s272_s13] sm:$0xf]  ;;  %s456_s10 = sshll.u32 %s258_s9, 4  ;;  %s822_s13 = scalar_lea.hbm %s874_s5, %s555_s8  ;;  %s824_s10 = int_to_ptr.vmem [resolvable:$true] %s456_s10 }
  0x1b   : > { %v273_v6 = vld [vmem:[%s265_s16] sm:$0xf]  ;;  %563 = vmatpush3.msk.msra.mxu0 %vm281_vm1, %v274_v5  ;;  %s631_s15 = scalar_lea.vmem %s824_s10, 128  ;;  %s635_s16 = sshll.u32 %s714_s21, 4  ;;  %s636_s16 = int_to_ptr.vmem [resolvable:$false] %s635_s16 }
  0x1c   : > { %568 = vmatpush3.msk.msra.mxu1 %vm281_vm1, %v273_v6  ;;  %565 = vmatmul.mubr.msk.f32.vlgmr.msra.gmra.mrb[0].mxu0 %vm277_vm2, %v276_v3  ;;  %p632_p12 = scmp.ne.s32.totalorder %s824_s10, %s631_s15  ;;  %s637_s17 = scalar_lea.vmem %s636_s16, 256 }
  0x1d   : > { %570 = vmatmul.mubr.msk.f32.vlgmr.msra.gmra.mrb[0].mxu1 %vm277_vm2, %v275_v4  ;;  %p638_p1 = scmp.lt.s32.totalorder %s824_s10, %s636_s16  ;;  %p639_p2 = scmp.lt.s32.totalorder %s637_s17, %s631_s15 }
  0x1e   : > { %p633_p13 = pnand %p632_p12, %p785_p4 }
  0x1f   : > { %p640_p3 = por %p639_p2, %p638_p1 }
  0x20   : > { %p634_p0 = pneg %p633_p13 }
  0x22   : > { %p641_p5 = pnand %p640_p3, %p634_p0 }
  0x91   : > { %v435_v7 = vpop.permute.xlu0 %434 }
  0xef   : > { %v351_v8 = vpop.f32.mrb[0].mxu0 }
  0xf0   : > { %v427_v9 = vpop.f32.mrb[0].mxu1  ;;  %v566_v11 = vpop.f32.mrb[1].mxu0 }
  0xf1   : > { %v428_v10 = vadd.f32 %v427_v9, %v351_v8  ;;  %v571_v12 = vpop.f32.mrb[1].mxu1 }
  0xf3   : > { %v437_v13 = vadd.f32 %v435_v7, %v428_v10 }
  0xf5   : > { %v438_v14 = vmax.f32 %v437_v13, 0.0 }
  0xf7   : > { %440 = vst.msk [vmem:[%s258_s9] sm:$0xff] %vm439_vm3, %v438_v14 }
  0xf8   : > { %644 = shalt.err (!%p641_p5)
}
  0xf9   : > { %s645_s24 = scalar_lea.hbm %s822_s13, 128  ;;  %s649_s29 = scalar_lea.hbm %s874_s5, 256 }
  0xfa   : > { %p646_p6 = scmp.ne.s32.totalorder %s822_s13, %s645_s24  ;;  %p650_p10 = scmp.lt.u32.totalorder %s822_s13, %s874_s5 }
  0xfb   : > { %p651_p11 = scmp.lt.u32.totalorder %s649_s29, %s645_s24  ;;  %p653_p13 = scmp.lt.u32.totalorder %s645_s24, %s822_s13 }
  0xfc   : > { %p647_p7 = pnand %p646_p6, %p785_p4 }
  0xfd   : > { %p652_p12 = por %p651_p11, %p650_p10 }
  0xfe   : > { %p648_p9 = pneg %p647_p7 }
  0xff   : > { %p654_p0 = por %p653_p13, %p652_p12 }
 0x101   : > { %p655_p1 = pnand %p654_p0, %p648_p9 }
 0x103   : > { %658 = shalt.err (!%p655_p1)
}
 0x104   : > { %572 = dma.vmem_to_hbm [thread:$0]  (%p785_p4), %s824_s10, 128, %s822_s13, %s442_s14  }
 0x105 PF: > { %p578_p2 = scmp.ge.s32.totalorder %s709_s23, 2  ;;  %s468_s9 = sand.u32 1, %s689_s18  }
 0x106   : > { %s469_s11 = scalar_lea.sflag [#allocation3], %s468_s9 }
 0x107   : > { %p575_p3 = pnand %p578_p2, %p792_p8 }
 0x109   : > { %684 = dma.done.wait (!%p575_p3), %s469_s11, 128  }
 0x10a   : > { %686 = vsyncadd (!%p575_p3), %s469_s11, 4294967168  ;;  %s18_s23 = sadd.s32 1, %s709_s23   ;;  %s877_s18 = smov %s693_s19 }
 0x10b   : > { %p15_p5 = scmp.ge.s32.totalorder %s18_s23, 4   ;;  %s878_s19 = smov %s697_s20 }
 0x10c   : > { %s879_s20 = smov %s798_s6  ;;  %s880_s21 = smov %s705_s22 }
 0x10d   : > { %s881_s22 = smov %s883_s26  ;;  %17 = sbr.rel (!%p15_p5) target bundleno = 4 (0x4), region = 78 }
 0x114   :  { %474 = vsyncpa [#allocation3], 1 }
 0x115   :  { %476 = vsyncpa [#allocation3 + $0x1], 1 }

</bundles_post_ra>
